<compile_context>
chip_gen: v5e
topology: v5e:2x2
jax: 0.10.0
libtpu: 0.0.40
codegen_flags: <defaults>
</compile_context>

<pallas_src>
import jax
import jax.numpy as jnp
from jax.experimental import pallas as pl
from jax.experimental.pallas import tpu as pltpu


def _heaviside_kernel(x_ref, o_ref):
    # Elementwise heaviside step on the current VMEM tile.
    o_ref[...] = (x_ref[...] > 0).astype(o_ref.dtype)


_LANE_CHOICES = (1024, 512, 256, 128)


def _pick_lanes(n):
    """Widest lane-dense last dim (multiple of 128) that exactly divides n."""
    for lanes in _LANE_CHOICES:
        if n % lanes == 0:
            return lanes
    return None  # ragged size: caller falls back to pure XLA


def heaviside_ste_forward(
    x,
    epsilon=0.1,
    *,
    out_dtype=jnp.float32,
    target_tile_bytes=2 * 1024 * 1024,
    min_pallas_bytes=1024 * 1024,
):
    """Pallas implementation of HeavisideSTE.forward: (x > 0).float().

    epsilon only shapes the surrogate gradient in the PyTorch backward pass;
    it is unused in the forward pass (kept for API parity).
    """
    del epsilon  # forward does not depend on epsilon
    # TODO(synk): backward-pass surrogate gradient (|x| < eps -> 1/(2*eps)) is
    # a custom_vjp concern, not part of this forward kernel.

    n = x.size
    in_itemsize = jnp.dtype(x.dtype).itemsize
    out_itemsize = jnp.dtype(out_dtype).itemsize

    # ---- small-input fast path -------------------------------------------
    # pallas_call launch + pipeline fill/drain dominates tiny tensors; XLA's
    # fused compare+cast is already at the HBM roofline there.
    if n == 0 or n * in_itemsize < min_pallas_bytes:
        return (x > 0).astype(out_dtype)

    # ---- ragged sizes: no pad/slice HBM round trips, just fused XLA --------
    lanes = _pick_lanes(n)
    if lanes is None:
        return (x > 0).astype(out_dtype)

    orig_shape = x.shape
    rows = n // lanes
    x2d = jnp.reshape(x, (rows, lanes))  # free row-major reinterpretation

    # ---- tile sizing: ~target_tile_bytes blocks, alignment-safe ------------
    # Sublane alignment: 8 for 4-byte dtypes, 16 for 2-byte, 32 for 1-byte.
    align = 8 * max(1, 4 // in_itemsize)
    tile_rows = (target_tile_bytes // (lanes * in_itemsize)) // align * align
    tile_rows = max(align, tile_rows)
    if tile_rows >= rows:
        # Full-extent sublane dim is always a legal block shape.
        tile_rows = rows
    grid = (pl.cdiv(rows, tile_rows),)

    # Double-buffered input + output tiles, plus headroom.
    tile_bytes = tile_rows * lanes * (in_itemsize + out_itemsize)
    vmem_limit = max(32 * 1024 * 1024, 4 * tile_bytes)

    out2d = pl.pallas_call(
        _heaviside_kernel,
        out_shape=jax.ShapeDtypeStruct((rows, lanes), out_dtype),
        grid_spec=pltpu.PrefetchScalarGridSpec(
            num_scalar_prefetch=0,
            grid=grid,
            in_specs=[pl.BlockSpec((tile_rows, lanes), lambda i: (i, 0))],
            out_specs=pl.BlockSpec((tile_rows, lanes), lambda i: (i, 0)),
        ),
        compiler_params=pltpu.CompilerParams(
            dimension_semantics=("parallel",),
            vmem_limit_bytes=vmem_limit,
        ),
    )(x2d)

    return jnp.reshape(out2d, orig_shape)


if __name__ == "__main__":
    key = jax.random.PRNGKey(0)
    epsilon = 0.1  # HeavisideSTE(epsilon=0.1); forward-irrelevant

    # 1) Canonical small NCHW input (module-typical shape): takes the
    #    small-input fast path.
    x_small = jax.random.normal(key, (2, 4, 16, 16), dtype=jnp.float32)
    y_small = heaviside_ste_forward(x_small, epsilon)
    jax.block_until_ready(y_small)
    ref_small = (x_small > 0).astype(jnp.float32)
    assert y_small.shape == x_small.shape and y_small.dtype == jnp.float32
    assert bool(jnp.all(y_small == ref_small))

    # 2) Same small input forced through the Pallas kernel path
    #    (single full-extent block).
    y_forced = heaviside_ste_forward(x_small, epsilon, min_pallas_bytes=0)
    jax.block_until_ready(y_forced)
    assert y_forced.shape == x_small.shape and y_forced.dtype == jnp.float32
    assert bool(jnp.all(y_forced == ref_small))

    # 3) Slightly larger lane-aligned input with a small tile target so the
    #    multi-step pipelined grid path is exercised.
    key2 = jax.random.fold_in(key, 1)
    x_med = jax.random.normal(key2, (4, 4, 64, 64), dtype=jnp.float32)
    y_med = heaviside_ste_forward(
        x_med, epsilon, min_pallas_bytes=0, target_tile_bytes=64 * 1024
    )
    jax.block_until_ready(y_med)
    assert bool(jnp.all(y_med == (x_med > 0).astype(jnp.float32)))

    # 4) Ragged size: pure-XLA fallback (no pad/slice copies).
    key3 = jax.random.fold_in(key, 2)
    x_rag = jax.random.normal(key3, (3, 5, 7), dtype=jnp.float32)
    y_rag = heaviside_ste_forward(x_rag, epsilon)
    jax.block_until_ready(y_rag)
    assert bool(jnp.all(y_rag == (x_rag > 0).astype(jnp.float32)))

    print("KERNEL_OK")
</pallas_src>

<mosaic_0001>
module attributes {stable_mosaic.version = 11 : i64} {
  func.func @_heaviside_kernel(%arg0: i32, %arg1: memref<2x1024xf32, #tpu.memory_space<vmem>>, %arg2: memref<2x1024xf32, #tpu.memory_space<vmem>>) attributes {dimension_semantics = [#tpu.dimension_semantics<parallel>], iteration_bounds = array<i64: 1>, scalar_prefetch = 0 : i64, scratch_operands = 0 : i64, tpu.core_type = #tpu.core_type<tc>, window_params = [{transform_indices = @transform_0, window_bounds = array<i64: 2, 1024>}, {transform_indices = @transform_1, window_bounds = array<i64: 2, 1024>}]} {
    %c0 = arith.constant 0 : index
    %c0_0 = arith.constant 0 : index
    %0 = vector.load %arg1[%c0, %c0_0] : memref<2x1024xf32, #tpu.memory_space<vmem>>, vector<2x1024xf32>
    %cst = arith.constant 0.000000e+00 : f32
    %1 = vector.broadcast %cst : f32 to vector<2x1024xf32>
    %2 = arith.cmpf ogt, %0, %1 : vector<2x1024xf32>
    %3 = arith.extui %2 : vector<2x1024xi1> to vector<2x1024xi32>
    %4 = arith.sitofp %3 : vector<2x1024xi32> to vector<2x1024xf32>
    %c0_1 = arith.constant 0 : index
    %c0_2 = arith.constant 0 : index
    %5 = vector.load %arg2[%c0_1, %c0_2] : memref<2x1024xf32, #tpu.memory_space<vmem>>, vector<2x1024xf32>
    tpu.vector_store %arg2[%c0_1, %c0_2], %4 {strides = array<i32>} : memref<2x1024xf32, #tpu.memory_space<vmem>>, vector<2x1024xf32>,
    return
  }
  func.func @transform_0(%arg0: i32) -> (i32, i32) {
    %c0_i32 = arith.constant 0 : i32
    %c0_i32_0 = arith.constant 0 : i32
    return %arg0, %c0_i32 : i32, i32
  }
  func.func @transform_1(%arg0: i32) -> (i32, i32) {
    %c0_i32 = arith.constant 0 : i32
    %c0_i32_0 = arith.constant 0 : i32
    return %arg0, %c0_i32 : i32, i32
  }
}

</mosaic_0001>

<bundles_post_ra>
// kernel: tpu_custom_call.1
= control target key start
LH: loop header
LB: loop body
LE: loop exit
PB: predicated region body
PF: predicated region fallthrough
CT: control target
= control target key end

     0   :  { %6 = vsyncpa [#allocation3], 0  ;;  %s126_s0 = inlined_call_operand.hbm [shape: f32[2,1024], index: 0, kind: input, shape index: {}]   ;;  %s127_s1 = inlined_call_operand.hbm [shape: f32[2,1024], index: 1, kind: output, shape index: {}]  }
   0x1   :  { %7 = vsyncpa [#allocation4], 0  ;;  %s13_s8 = sshll.u32 %s126_s0, 4  ;;  %s107_s9 = smov [#allocation2]   ;;  %s14_s8 = int_to_ptr.hbm [resolvable:$true] %s13_s8 }
   0x2   :  { %s15_s10 = sshll.u32 %s107_s9, 4  ;;  %s16_s10 = int_to_ptr.vmem [resolvable:$true] %s15_s10 }
   0x3   :  { %18 = dma.hbm_to_vmem [thread:$0]  %s14_s8, 256, %s16_s10, [#allocation3]  }
   0x4   :  { %103 = dma.done.wait [#allocation3], 256  }
   0x5   :  { %104 = vsyncadd [#allocation3], 4294967040  ;;  %s108_s11 = smov [#allocation5]   ;;  %s40_s15 = sshll.u32 %s127_s1, 4  ;;  %v23_v0 = vld [vmem:[#allocation2] sm:$0xff]  ;;  %v24_v1 = vld [vmem:[#allocation2 + $0x8] sm:$0xff]  ;;  %s41_s15 = int_to_ptr.hbm [resolvable:$true] %s40_s15 }
   0x6   :  { %s38_s12 = sshll.u32 %s108_s11, 4  ;;  %vm25_vm0 = vcmp.gt.f32.partialorder %v23_v0, 0.0  ;;  %vm26_vm1 = vcmp.gt.f32.partialorder %v24_v1, 0.0  ;;  %v109_v2 = vmov 0.0   ;;  %s39_s12 = int_to_ptr.vmem [resolvable:$true] %s38_s12 }
   0x7   :  { %v50_v3 = vsel %vm25_vm0, 1.0, %v109_v2  ;;  %v51_v4 = vsel %vm26_vm1, 1.0, %v109_v2 }
   0x8   :  { %31 = vst [vmem:[#allocation5] sm:$0xff] %v50_v3 }
   0x9   :  { %32 = vst [vmem:[#allocation5 + $0x8] sm:$0xff] %v51_v4 }
   0xa   :  { %43 = dma.vmem_to_hbm [thread:$0]  %s39_s12, 256, %s41_s15, [#allocation4]  }
   0xb   :  { %105 = dma.done.wait [#allocation4], 256  }
   0xc   :  { %106 = vsyncadd [#allocation4], 4294967040 }
   0xd   :  { %48 = vsyncpa [#allocation3], 1 }
   0xe   :  { %49 = vsyncpa [#allocation4], 1 }

</bundles_post_ra>
